<compile_context>
chip_gen: v5e
topology: v5e:2x2
jax: 0.10.0
libtpu: 0.0.40
codegen_flags: <defaults>
</compile_context>

<pallas_src>
import functools

import jax
import jax.numpy as jnp
from jax.experimental import pallas as pl
from jax.experimental.pallas import tpu as pltpu

_LANES = 128
_MAX_TILE_ROWS = 2048  # 3 ch x 2048 x 128 f32 = 3 MiB per block (in + out, x2 buf ~ 12 MiB)


def _basis_kernel(w_ref, x_ref, o_ref, *, bdim, compute_dtype):
    """One (spatial-tile, b) block: out[c] = sum_f w[b,c,f] * x[c]**f via Horner."""
    for c in range(3):
        x = x_ref[0, c, :, :].astype(compute_dtype)
        if bdim == 1:
            acc = jnp.full(x.shape, w_ref[0, c, 0], dtype=compute_dtype)
        else:
            # Horner init without a full-tile broadcast materialization;
            # weights are scalar reads from SMEM.
            acc = x * w_ref[0, c, bdim - 1].astype(compute_dtype) \
                + w_ref[0, c, bdim - 2].astype(compute_dtype)
            for f in range(bdim - 3, -1, -1):
                acc = acc * x + w_ref[0, c, f].astype(compute_dtype)
        o_ref[0, c, :, :] = acc.astype(o_ref.dtype)


def function_basis_forward(image, parameters, bdim):
    """image: (B, 3, H, W); parameters: (B, 3*bdim). Returns (B, 3, H, W)."""
    B, C, H, W = image.shape
    assert C == 3
    assert parameters.shape == (B, C * bdim)
    S = H * W

    # Lane-dense layout: flatten spatial dims into (rows, 128) slabs.
    # Only pad to the 128-lane boundary (no rounding to a tile multiple).
    rows = -(-S // _LANES)
    s_pad = rows * _LANES

    x = image.reshape(B, C, S)
    if s_pad != S:
        x = jnp.pad(x, ((0, 0), (0, 0), (0, s_pad - S)))
    x = x.reshape(B, C, rows, _LANES)
    w = parameters.reshape(B, C, bdim).astype(jnp.float32)

    # Either the full row extent (valid even if not a multiple of 8) or a
    # sublane-aligned 2048-row tile; Pallas masks the ragged last block.
    tile_rows = rows if rows <= _MAX_TILE_ROWS else _MAX_TILE_ROWS
    num_tiles = pl.cdiv(rows, tile_rows)

    # bf16 Horner only when VALU-bound on a bf16-native VPU (v6e/v7x, large bdim).
    if image.dtype == jnp.bfloat16 and bdim >= 10:
        compute_dtype = jnp.bfloat16
    else:
        compute_dtype = jnp.float32

    itemsize = jnp.dtype(image.dtype).itemsize
    cost = pl.CostEstimate(
        flops=2 * max(bdim - 1, 1) * B * C * S,
        transcendentals=0,
        bytes_accessed=2 * B * C * S * itemsize + B * C * bdim * 4,
    )

    kernel = functools.partial(_basis_kernel, bdim=bdim, compute_dtype=compute_dtype)

    out = pl.pallas_call(
        kernel,
        out_shape=jax.ShapeDtypeStruct((B, C, rows, _LANES), image.dtype),
        grid=(num_tiles, B),  # large spatial-tile axis leads (v7x TC balance)
        in_specs=[
            # per-batch basis weights for all 3 channels, read as scalars from SMEM
            pl.BlockSpec((1, C, bdim), lambda s, b: (b, 0, 0),
                         memory_space=pltpu.MemorySpace.SMEM),
            # lane-dense spatial slab, all 3 channels folded into the block
            pl.BlockSpec((1, C, tile_rows, _LANES), lambda s, b: (b, 0, s, 0)),
        ],
        out_specs=pl.BlockSpec((1, C, tile_rows, _LANES), lambda s, b: (b, 0, s, 0)),
        compiler_params=pltpu.CompilerParams(
            dimension_semantics=("parallel", "parallel"),
            vmem_limit_bytes=32 * 1024 * 1024,
        ),
        cost_estimate=cost,
    )(w, x)

    out = out.reshape(B, C, s_pad)
    if s_pad != S:
        out = out[:, :, :S]
    return out.reshape(B, C, H, W)


def _reference(image, parameters, bdim):
    """Pure-JAX reference: explicit expand + einsum, matching PyTorch forward."""
    B = image.shape[0]
    x = jnp.stack([image ** f for f in range(bdim)], axis=2)  # B,3,D,H,W
    w = parameters.reshape(B, 3, bdim)
    return jnp.einsum('bcfij,bcf->bcij', x, w)


if __name__ == "__main__":
    B, C, H, W = 2, 3, 16, 16
    BDIM = 4

    key = jax.random.PRNGKey(0)
    k_img, k_par = jax.random.split(key)
    image = jax.random.uniform(k_img, (B, C, H, W), dtype=jnp.float32)
    parameters = jax.random.normal(k_par, (B, 3 * BDIM), dtype=jnp.float32)

    out = function_basis_forward(image, parameters, BDIM)
    out = jax.block_until_ready(out)

    ref = _reference(image, parameters, BDIM)
    assert out.shape == (B, C, H, W)
    assert jnp.allclose(out, ref, atol=1e-5, rtol=1e-5)

    print("KERNEL_OK")
</pallas_src>

<mosaic_0001>
module attributes {stable_mosaic.version = 11 : i64} {
  func.func @_basis_kernel(%arg0: i32, %arg1: i32, %arg2: memref<1x3x4xf32, #tpu.memory_space<smem>>, %arg3: memref<1x3x2x128xf32, #tpu.memory_space<vmem>>, %arg4: memref<1x3x2x128xf32, #tpu.memory_space<vmem>>) attributes {dimension_semantics = [#tpu.dimension_semantics<parallel>, #tpu.dimension_semantics<parallel>], iteration_bounds = array<i64: 1, 2>, scalar_prefetch = 0 : i64, scratch_operands = 0 : i64, tpu.core_type = #tpu.core_type<tc>, window_params = [{transform_indices = @transform_0, window_bounds = array<i64: 1, 3, 4>}, {transform_indices = @transform_1, window_bounds = array<i64: 1, 3, 2, 128>}, {transform_indices = @transform_2, window_bounds = array<i64: 1, 3, 2, 128>}]} {
    %c0 = arith.constant 0 : index
    %c0_0 = arith.constant 0 : index
    %c0_1 = arith.constant 0 : index
    %c0_2 = arith.constant 0 : index
    %0 = vector.load %arg3[%c0, %c0_0, %c0_1, %c0_2] : memref<1x3x2x128xf32, #tpu.memory_space<vmem>>, vector<1x1x2x128xf32>
    %1 = vector.shape_cast %0 : vector<1x1x2x128xf32> to vector<2x128xf32>
    %c0_3 = arith.constant 0 : index
    %c0_4 = arith.constant 0 : index
    %c3 = arith.constant 3 : index
    %2 = memref.load %arg2[%c0_3, %c0_4, %c3] : memref<1x3x4xf32, #tpu.memory_space<smem>>
    %3 = vector.broadcast %2 : f32 to vector<2x128xf32>
    %4 = arith.mulf %1, %3 : vector<2x128xf32>
    %c0_5 = arith.constant 0 : index
    %c0_6 = arith.constant 0 : index
    %c2 = arith.constant 2 : index
    %5 = memref.load %arg2[%c0_5, %c0_6, %c2] : memref<1x3x4xf32, #tpu.memory_space<smem>>
    %6 = vector.broadcast %5 : f32 to vector<2x128xf32>
    %7 = arith.addf %4, %6 : vector<2x128xf32>
    %8 = arith.mulf %7, %1 : vector<2x128xf32>
    %c0_7 = arith.constant 0 : index
    %c0_8 = arith.constant 0 : index
    %c1 = arith.constant 1 : index
    %9 = memref.load %arg2[%c0_7, %c0_8, %c1] : memref<1x3x4xf32, #tpu.memory_space<smem>>
    %10 = vector.broadcast %9 : f32 to vector<2x128xf32>
    %11 = arith.addf %8, %10 : vector<2x128xf32>
    %12 = arith.mulf %11, %1 : vector<2x128xf32>
    %c0_9 = arith.constant 0 : index
    %c0_10 = arith.constant 0 : index
    %c0_11 = arith.constant 0 : index
    %13 = memref.load %arg2[%c0_9, %c0_10, %c0_11] : memref<1x3x4xf32, #tpu.memory_space<smem>>
    %14 = vector.broadcast %13 : f32 to vector<2x128xf32>
    %15 = arith.addf %12, %14 : vector<2x128xf32>
    %c0_12 = arith.constant 0 : index
    %c0_13 = arith.constant 0 : index
    %c0_14 = arith.constant 0 : index
    %c0_15 = arith.constant 0 : index
    %16 = vector.load %arg4[%c0_12, %c0_13, %c0_14, %c0_15] : memref<1x3x2x128xf32, #tpu.memory_space<vmem>>, vector<1x1x2x128xf32>
    %17 = vector.shape_cast %16 : vector<1x1x2x128xf32> to vector<2x128xf32>
    %18 = vector.shape_cast %15 : vector<2x128xf32> to vector<1x1x2x128xf32>
    tpu.vector_store %arg4[%c0_12, %c0_13, %c0_14, %c0_15], %18 {strides = array<i32>} : memref<1x3x2x128xf32, #tpu.memory_space<vmem>>, vector<1x1x2x128xf32>,
    %c0_16 = arith.constant 0 : index
    %c1_17 = arith.constant 1 : index
    %c0_18 = arith.constant 0 : index
    %c0_19 = arith.constant 0 : index
    %19 = vector.load %arg3[%c0_16, %c1_17, %c0_18, %c0_19] : memref<1x3x2x128xf32, #tpu.memory_space<vmem>>, vector<1x1x2x128xf32>
    %20 = vector.shape_cast %19 : vector<1x1x2x128xf32> to vector<2x128xf32>
    %c0_20 = arith.constant 0 : index
    %c1_21 = arith.constant 1 : index
    %c3_22 = arith.constant 3 : index
    %21 = memref.load %arg2[%c0_20, %c1_21, %c3_22] : memref<1x3x4xf32, #tpu.memory_space<smem>>
    %22 = vector.broadcast %21 : f32 to vector<2x128xf32>
    %23 = arith.mulf %20, %22 : vector<2x128xf32>
    %c0_23 = arith.constant 0 : index
    %c1_24 = arith.constant 1 : index
    %c2_25 = arith.constant 2 : index
    %24 = memref.load %arg2[%c0_23, %c1_24, %c2_25] : memref<1x3x4xf32, #tpu.memory_space<smem>>
    %25 = vector.broadcast %24 : f32 to vector<2x128xf32>
    %26 = arith.addf %23, %25 : vector<2x128xf32>
    %27 = arith.mulf %26, %20 : vector<2x128xf32>
    %c0_26 = arith.constant 0 : index
    %c1_27 = arith.constant 1 : index
    %c1_28 = arith.constant 1 : index
    %28 = memref.load %arg2[%c0_26, %c1_27, %c1_28] : memref<1x3x4xf32, #tpu.memory_space<smem>>
    %29 = vector.broadcast %28 : f32 to vector<2x128xf32>
    %30 = arith.addf %27, %29 : vector<2x128xf32>
    %31 = arith.mulf %30, %20 : vector<2x128xf32>
    %c0_29 = arith.constant 0 : index
    %c1_30 = arith.constant 1 : index
    %c0_31 = arith.constant 0 : index
    %32 = memref.load %arg2[%c0_29, %c1_30, %c0_31] : memref<1x3x4xf32, #tpu.memory_space<smem>>
    %33 = vector.broadcast %32 : f32 to vector<2x128xf32>
    %34 = arith.addf %31, %33 : vector<2x128xf32>
    %c0_32 = arith.constant 0 : index
    %c1_33 = arith.constant 1 : index
    %c0_34 = arith.constant 0 : index
    %c0_35 = arith.constant 0 : index
    %35 = vector.load %arg4[%c0_32, %c1_33, %c0_34, %c0_35] : memref<1x3x2x128xf32, #tpu.memory_space<vmem>>, vector<1x1x2x128xf32>
    %36 = vector.shape_cast %35 : vector<1x1x2x128xf32> to vector<2x128xf32>
    %37 = vector.shape_cast %34 : vector<2x128xf32> to vector<1x1x2x128xf32>
    tpu.vector_store %arg4[%c0_32, %c1_33, %c0_34, %c0_35], %37 {strides = array<i32>} : memref<1x3x2x128xf32, #tpu.memory_space<vmem>>, vector<1x1x2x128xf32>,
    %c0_36 = arith.constant 0 : index
    %c2_37 = arith.constant 2 : index
    %c0_38 = arith.constant 0 : index
    %c0_39 = arith.constant 0 : index
    %38 = vector.load %arg3[%c0_36, %c2_37, %c0_38, %c0_39] : memref<1x3x2x128xf32, #tpu.memory_space<vmem>>, vector<1x1x2x128xf32>
    %39 = vector.shape_cast %38 : vector<1x1x2x128xf32> to vector<2x128xf32>
    %c0_40 = arith.constant 0 : index
    %c2_41 = arith.constant 2 : index
    %c3_42 = arith.constant 3 : index
    %40 = memref.load %arg2[%c0_40, %c2_41, %c3_42] : memref<1x3x4xf32, #tpu.memory_space<smem>>
    %41 = vector.broadcast %40 : f32 to vector<2x128xf32>
    %42 = arith.mulf %39, %41 : vector<2x128xf32>
    %c0_43 = arith.constant 0 : index
    %c2_44 = arith.constant 2 : index
    %c2_45 = arith.constant 2 : index
    %43 = memref.load %arg2[%c0_43, %c2_44, %c2_45] : memref<1x3x4xf32, #tpu.memory_space<smem>>
    %44 = vector.broadcast %43 : f32 to vector<2x128xf32>
    %45 = arith.addf %42, %44 : vector<2x128xf32>
    %46 = arith.mulf %45, %39 : vector<2x128xf32>
    %c0_46 = arith.constant 0 : index
    %c2_47 = arith.constant 2 : index
    %c1_48 = arith.constant 1 : index
    %47 = memref.load %arg2[%c0_46, %c2_47, %c1_48] : memref<1x3x4xf32, #tpu.memory_space<smem>>
    %48 = vector.broadcast %47 : f32 to vector<2x128xf32>
    %49 = arith.addf %46, %48 : vector<2x128xf32>
    %50 = arith.mulf %49, %39 : vector<2x128xf32>
    %c0_49 = arith.constant 0 : index
    %c2_50 = arith.constant 2 : index
    %c0_51 = arith.constant 0 : index
    %51 = memref.load %arg2[%c0_49, %c2_50, %c0_51] : memref<1x3x4xf32, #tpu.memory_space<smem>>
    %52 = vector.broadcast %51 : f32 to vector<2x128xf32>
    %53 = arith.addf %50, %52 : vector<2x128xf32>
    %c0_52 = arith.constant 0 : index
    %c2_53 = arith.constant 2 : index
    %c0_54 = arith.constant 0 : index
    %c0_55 = arith.constant 0 : index
    %54 = vector.load %arg4[%c0_52, %c2_53, %c0_54, %c0_55] : memref<1x3x2x128xf32, #tpu.memory_space<vmem>>, vector<1x1x2x128xf32>
    %55 = vector.shape_cast %54 : vector<1x1x2x128xf32> to vector<2x128xf32>
    %56 = vector.shape_cast %53 : vector<2x128xf32> to vector<1x1x2x128xf32>
    tpu.vector_store %arg4[%c0_52, %c2_53, %c0_54, %c0_55], %56 {strides = array<i32>} : memref<1x3x2x128xf32, #tpu.memory_space<vmem>>, vector<1x1x2x128xf32>,
    return
  }
  func.func @transform_0(%arg0: i32, %arg1: i32) -> (i32, i32, i32) {
    %c0_i32 = arith.constant 0 : i32
    %c0_i32_0 = arith.constant 0 : i32
    %c0_i32_1 = arith.constant 0 : i32
    return %arg1, %c0_i32, %c0_i32_0 : i32, i32, i32
  }
  func.func @transform_1(%arg0: i32, %arg1: i32) -> (i32, i32, i32, i32) {
    %c0_i32 = arith.constant 0 : i32
    %c0_i32_0 = arith.constant 0 : i32
    %c0_i32_1 = arith.constant 0 : i32
    return %arg1, %c0_i32, %arg0, %c0_i32_0 : i32, i32, i32, i32
  }
  func.func @transform_2(%arg0: i32, %arg1: i32) -> (i32, i32, i32, i32) {
    %c0_i32 = arith.constant 0 : i32
    %c0_i32_0 = arith.constant 0 : i32
    %c0_i32_1 = arith.constant 0 : i32
    return %arg1, %c0_i32, %arg0, %c0_i32_0 : i32, i32, i32, i32
  }
}

</mosaic_0001>

<bundles_post_ra>
// kernel: tpu_custom_call.1
= control target key start
LH: loop header
LB: loop body
LE: loop exit
PB: predicated region body
PF: predicated region fallthrough
CT: control target
= control target key end

     0   :  { %7 = vsyncpa [#allocation4], 0  ;;  %s750_s0 = inlined_call_operand.vmem [shape: f32[2,3,4], index: 0, kind: input, shape index: {}]   ;;  %s751_s1 = inlined_call_operand.vmem [shape: f32[2,3,2,128], index: 1, kind: input, shape index: {}]   ;;  %s752_s2 = inlined_call_operand.hbm [shape: f32[2,3,2,128], index: 2, kind: output, shape index: {}]  }
   0x1   :  { %9 = vsyncpa [#allocation4 + $0x1], 0 }
   0x2   :  { %10 = vsyncpa [#allocation3], 0 }
   0x3   :  { %12 = vsyncpa [#allocation3 + $0x1], 0  ;;  %s595_s9 = smov 0   ;;  %s597_s10 = smov 0  }
   0x4   :  { %s599_s11 = smov 0   ;;  %s601_s12 = smov 0  }
   0x5   :  { %s603_s13 = smov 0   ;;  %s605_s14 = smov 0  }
   0x6 LB: > { %s375_s15 = sadd.s32 4294967295, %s566_s14   ;;  %s376_s16 = sadd.s32 4294967294, %s566_s14   ;;  %s566_s14 = sphi %s605_s14, %s18_s14   ;;  %s562_s13 = sphi %s603_s13, %s761_s13   ;;  %s558_s12 = sphi %s601_s12, %s760_s12   ;;  %s554_s11 = sphi %s599_s11, %s759_s11   ;;  %s550_s10 = sphi %s597_s10, %s758_s10   ;;  %s546_s9 = sphi %s595_s9, %s757_s9  }
   0x7   : > { %s27_s17 = sadd.s32 1, %s562_s13  ;;  %s37_s18 = sadd.s32 1, %s554_s11 }
   0x8   : > { %p28_p0 = scmp.ge.s32.totalorder %s27_s17, 2  ;;  %p44_p1 = scmp.ne.s32.totalorder %s554_s11, %s550_s10 }
   0x9   : > { %p45_p2 = scmp.eq.s32.totalorder %s566_s14, 0  ;;  %p50_p3 = scmp.ne.s32.totalorder %s550_s10, %s546_s9 }
   0xa   : > { %s763_s17 = smov (%p28_p0, %s27_s17), 0  ;;  %p51_p5 = scmp.eq.s32.totalorder %s375_s15, 0 }
   0xb   : > { %p636_p4 = por %p45_p2, %p44_p1  ;;  %s34_s20 = ssub.s32 %s562_s13, %s763_s17 }
   0xc   : > { %p104_p6 = scmp.eq.s32.totalorder %s375_s15, 1  ;;  %p35_p7 = scmp.eq.s32.totalorder %s34_s20, 0 }
   0xd   : > { %p642_p8 = por %p51_p5, %p50_p3  ;;  %p110_p10 = scmp.eq.s32.totalorder %s376_s16, 1 }
   0xe   : > { %p646_p9 = por %p104_p6, %p44_p1  ;;  %p378_p12 = scmp.ge.s32.totalorder %s566_s14, 2 }
   0xf   : > { %s651_s23 = scalar_select %p35_p7, %s554_s11, %s37_s18  }
  0x10   : > { %p653_p11 = por %p110_p10, %p50_p3  ;;  %p407_p13 = scmp.lt.s32.totalorder %s566_s14, 2 }
  0x11   : > { %s130_s25 = sand.u32 1, %s554_s11   ;;  %s380_s27 = sshll.u32 %s562_s13, 2 }
  0x12   : > { %s379_s26 = sshll.u32 %s130_s25, 9  ;;  %s138_s30 = scalar_lea.vmem %s750_s0, %s380_s27 }
  0x13   : > { %p400_p0 = pnand %p407_p13, %p636_p4  ;;  %s140_s3 = sshll.u32 %s138_s30, 4  ;;  %s141_s3 = int_to_ptr.vmem [resolvable:$true] %s140_s3 }
  0x14   : > { %p381_p1 = scmp.ge.s32.totalorder %s566_s14, 1  ;;  %s134_s4 = scalar_lea.smem [#allocation2], %s379_s26 }
  0x15   : > { %s131_s5 = scalar_lea.sflag [#allocation4], %s130_s25  ;;  %p156_p2 = scmp.lt.s32.totalorder %s566_s14, 3 }
  0x16   : > { %402 = dma.vmem_to_smem (!%p400_p0), %s141_s3, 64, %s134_s4, %s131_s5  }
  0x17   : > { %p157_p3 = pnand %p381_p1, %p156_p2 }
  0x18   : > { %s669_s6 = sand.u32 (!%p157_p3), 1, %s550_s10  }
  0x19   : > { %160 = sbr.rel (%p157_p3) target bundleno = 67 (0x43), region = 28  ;;  %s382_s7 = sshll.u32 (!%p157_p3), %s669_s6, 9 }
  0x1a   : > { %s163_s8 = scalar_lea.sflag (!%p157_p3), [#allocation4], %s669_s6  ;;  %s673_s15 = scalar_lea.smem (!%p157_p3), [#allocation2], %s382_s7 }
  0x1e   : > { %537 = dma.done.wait (%p642_p8), %s163_s8, 64  }
  0x1f   : > { %539 = vsyncadd (%p642_p8), %s163_s8, 4294967232 }
  0x20   : > { %172 = sfence }
  0x21   : > { %p197_p4 = scmp.lt.s32.totalorder %s558_s12, 1  ;;  %s568_s16 = smov 3  }
  0x22   : > { %s206_s18 = sld [smem:[%s673_s15 + %s568_s16]]  ;;  %s569_s20 = smov 2  }
  0x23   : > { %s198_s19 = scalar_select %p197_p4, %s558_s12, 1 }
  0x24   : > { %s209_s25 = sld [smem:[%s673_s15 + %s569_s20]]  ;;  %s570_s27 = smov 1  }
  0x25   : > { %s393_s26 = smul.u32 6, %s198_s19  ;;  %s213_s21 = sld [smem:[%s673_s15 + %s570_s27]] }
  0x26   : > { %s690_s3 = sld [smem:[#allocation2 + %s382_s7]]  ;;  %s571_s4 = smov 131  }
  0x27   : > { %s688_s30 = scalar_lea.vmem %s751_s1, %s393_s26  ;;  %s223_s5 = sld [smem:[%s673_s15 + %s571_s4]] }
  0x28   : > { %v205_v0 = vld [vmem:[%s688_s30] sm:$0x3]  ;;  %v207_v1 = vstv %s206_s18  ;;  %s572_s8 = smov 130   ;;  %s573_s19 = smov 129   ;;  %v385_v7 = vld [vmem:[%s688_s30 + $0x2] sm:$0x3] }
  0x29   : > { %v208_v2 = vmul.f32 %v207_v1, %v205_v0  ;;  %s226_s16 = sld [smem:[%s673_s15 + %s572_s8]]  ;;  %s574_s7 = smov 128   ;;  %v387_v14 = vld [vmem:[%s688_s30 + $0x4] sm:$0x3] }
  0x2a   : > { %v210_v3 = vstv %s209_s25  ;;  %s696_s26 = sld [smem:[%s673_s15 + %s573_s19]]  ;;  %s575_s18 = smov 259  }
  0x2b   : > { %v211_v4 = vadd.f32 %v210_v3, %v208_v2  ;;  %v214_v5 = vstv %s213_s21  ;;  %s699_s27 = sld [smem:[%s673_s15 + %s574_s7]]  ;;  %s392_s29 = smul.u32 6, %s669_s6 }
  0x2c   : > { %s241_s28 = sld [smem:[%s673_s15 + %s575_s18]]  ;;  %s576_s25 = smov 258   ;;  %v218_v10 = vstv %s690_s3 }
  0x2d   : > { %v212_v6 = vmul.f32 %v211_v4, %v205_v0  ;;  %s244_s4 = sld [smem:[%s673_s15 + %s576_s25]]  ;;  %v224_v9 = vstv %s223_s5  ;;  %s577_s8 = smov 257  }
  0x2e   : > { %s248_s19 = sld [smem:[%s673_s15 + %s577_s8]]  ;;  %v225_v11 = vmul.f32 %v385_v7, %v224_v9  ;;  %s578_s21 = smov 256  }
  0x2f   : > { %v215_v8 = vadd.f32 %v214_v5, %v212_v6  ;;  %v227_v12 = vstv %s226_s16  ;;  %s252_s7 = sld [smem:[%s673_s15 + %s578_s21]]  ;;  %s394_s18 = smul.u32 6, %s558_s12 }
  0x30   : > { %v228_v15 = vadd.f32 %v227_v12, %v225_v11  ;;  %v231_v17 = vstv %s696_s26  ;;  %s196_s5 = scalar_lea.vmem [#allocation5], %s392_s29  ;;  %s258_s12 = scalar_lea.sflag [#allocation3], %s669_s6 }
  0x31   : > { %v216_v13 = vmul.f32 %v215_v8, %v205_v0  ;;  %v235_v24 = vstv %s699_s27  ;;  %s270_s16 = scalar_lea.hbm %s752_s2, %s394_s18  ;;  %s271_s26 = sshll.u32 %s196_s5, 4  ;;  %s272_s26 = int_to_ptr.vmem [resolvable:$true] %s271_s26 }
  0x32   : > { %v242_v18 = vstv %s241_s28  ;;  %v229_v19 = vmul.f32 %v385_v7, %v228_v15  ;;  %s273_s15 = sshll.u32 %s270_s16, 4  ;;  %s274_s15 = int_to_ptr.hbm [resolvable:$true] %s273_s15 }
  0x33   : > { %v219_v16 = vadd.f32 %v218_v10, %v216_v13  ;;  %v243_v20 = vmul.f32 %v387_v14, %v242_v18  ;;  %v245_v21 = vstv %s244_s4  ;;  %s498_s27 = sshra.s32 %s274_s15, 4  ;;  %s504_s4 = scalar_lea.hbm %s752_s2, 12  ;;  %s499_s27 = int_to_ptr.hbm [resolvable:$true] %s498_s27 }
  0x34   : > { %v232_v22 = vadd.f32 %v231_v17, %v229_v19  ;;  %v249_v25 = vstv %s248_s19  ;;  %s500_s28 = scalar_lea.hbm %s499_s27, 6  ;;  %p505_p8 = scmp.lt.s32.totalorder %s499_s27, %s752_s2 }
  0x35   : > { %220 = vst [vmem:[%s196_s5] sm:$0x3] %v219_v16  ;;  %v246_v23 = vadd.f32 %v245_v21, %v243_v20  ;;  %v253_v30 = vstv %s252_s7  ;;  %p501_p5 = scmp.ne.s32.totalorder %s499_s27, %s500_s28  ;;  %p506_p10 = scmp.lt.s32.totalorder %s504_s4, %s500_s28 }
  0x36   : > { %v233_v26 = vmul.f32 %v385_v7, %v232_v22 }
  0x37   : > { %v247_v27 = vmul.f32 %v387_v14, %v246_v23  ;;  %p502_p6 = pnand %p501_p5, %p646_p9  ;;  %p507_p13 = por %p506_p10, %p505_p8 }
  0x38   : > { %v236_v28 = vadd.f32 %v235_v24, %v233_v26 }
  0x39   : > { %v250_v29 = vadd.f32 %v249_v25, %v247_v27  ;;  %p503_p7 = pneg %p502_p6 }
  0x3a   : > { %386 = vst [vmem:[%s196_s5 + $0x2] sm:$0x3] %v236_v28 }
  0x3b   : > { %v251_v31 = vmul.f32 %v387_v14, %v250_v29  ;;  %p508_p0 = pnand %p507_p13, %p503_p7 }
  0x3d   : > { %v254_v32 = vadd.f32 %v253_v30, %v251_v31 }
  0x3f   : > { %388 = vst [vmem:[%s196_s5 + $0x4] sm:$0x3] %v254_v32 }
  0x40   : > { %511 = shalt.err (!%p508_p0)
}
  0x41   : > { %s579_s6 = smov 32  }
  0x42   : > { %397 = dma.vmem_to_hbm [thread:$0]  (%p646_p9), %s272_s26, 96, %s274_s15, %s258_s12, %s579_s6, %s579_s6, %s569_s20  }
  0x43 PF: > { %s288_s21 = sand.u32 1, %s546_s9   ;;  %p404_p1 = pnand %p378_p12, %p653_p11 }
  0x44   : > { %s289_s7 = scalar_lea.sflag [#allocation3], %s288_s21 }
  0x45   : > { %p405_p2 = pneg %p404_p1 }
  0x47   : > { %541 = dma.done.wait (%p405_p2), %s289_s7, 96  }
  0x48   : > { %543 = vsyncadd (%p405_p2), %s289_s7, 4294967200  ;;  %s18_s14 = sadd.s32 1, %s566_s14   ;;  %s757_s9 = smov %s550_s10 }
  0x49   : > { %p15_p3 = scmp.ge.s32.totalorder %s18_s14, 4   ;;  %s758_s10 = smov %s554_s11 }
  0x4a   : > { %s759_s11 = smov %s651_s23  ;;  %s760_s12 = smov %s562_s13 }
  0x4b   : > { %s761_s13 = smov %s763_s17  ;;  %17 = sbr.rel (!%p15_p3) target bundleno = 6 (0x6), region = 80 }
  0x50   :  { %295 = vsyncpa [#allocation3], 1 }
  0x51   :  { %297 = vsyncpa [#allocation3 + $0x1], 1 }
  0x52   :  { %298 = vsyncpa [#allocation4], 1 }
  0x53   :  { %300 = vsyncpa [#allocation4 + $0x1], 1 }

</bundles_post_ra>
